<compile_context>
chip_gen: v6e
topology: v6e:2x2x1
jax: 0.10.0
libtpu: 0.0.40
codegen_flags: <defaults>
</compile_context>

<pallas_src>
import jax
import jax.numpy as jnp
from jax.experimental import pallas as pl
from jax.experimental.pallas import tpu as pltpu


# ----------------------------- fused Pallas kernel ---------------------------

def _fused_prefix_kernel(x_ref, p_ref, o_ref):
    """Linear -> ReLU -> Linear -> ReLU, all in VMEM, emit every intermediate.

    p_ref is the packed parameter slab:
        rows 0..H-1 : [ W1^T | W2^T ]   (each H x H)
        row  H      : [ b1   | b2   ]
        rows H+1..  : zero padding (sublane alignment)
    Output tile is (tb, 4*H): [h1 | relu(h1) | h3 | relu(h3)] along the lane
    axis (4*32 = 128 lanes -> lane-dense, unmasked store).
    """
    H = x_ref.shape[-1]
    x = x_ref[...]

    w1t = p_ref[0:H, 0:H]          # static views into the resident slab
    w2t = p_ref[0:H, H:2 * H]
    b1 = p_ref[H:H + 1, 0:H]
    b2 = p_ref[H:H + 1, H:2 * H]

    h1 = jnp.dot(x, w1t, preferred_element_type=jnp.float32) + b1
    h2 = jnp.maximum(h1, 0.0)
    h3 = jnp.dot(h2, w2t, preferred_element_type=jnp.float32) + b2
    h4 = jnp.maximum(h3, 0.0)

    o_ref[...] = jnp.concatenate([h1, h2, h3, h4], axis=-1).astype(o_ref.dtype)


def _pick_tb(B, cap=512):
    """Batch tile: multiple of 8, capped, and >=2 grid steps once B >= 16
    so the 'parallel' grid axis can shard across v7x's two TensorCores."""
    if B <= 8:
        return B                      # single block == full array dim -> legal
    tb = max(8, ((B // 2) // 8) * 8)  # at least 2 grid steps, multiple of 8
    return min(tb, cap)


def fused_prefix_forward(x, params_slab):
    """One pallas_call producing all intermediate activations, stacked on lanes."""
    B, H = x.shape
    PR, PC = params_slab.shape
    tb = _pick_tb(B)
    grid = (pl.cdiv(B, tb),)
    return pl.pallas_call(
        _fused_prefix_kernel,
        out_shape=jax.ShapeDtypeStruct((B, 4 * H), x.dtype),
        grid=grid,
        in_specs=[
            # x: batch-tiled, double-buffered by default.
            pl.BlockSpec((tb, H), lambda i: (i, 0)),
            # packed params: constant across grid -> single-buffered, resident.
            pl.BlockSpec((PR, PC), lambda i: (0, 0),
                         pipeline_mode=pl.Buffered(1)),
        ],
        out_specs=pl.BlockSpec((tb, 4 * H), lambda i: (i, 0)),
        compiler_params=pltpu.CompilerParams(
            dimension_semantics=("parallel",)),
    )(x, params_slab)


@jax.jit
def _forward_slab(x, params_slab):
    """Single fused forward pass; returns the (B, 4H) activation slab."""
    return fused_prefix_forward(x, params_slab)


def _pack_params(w1, b1, w2, b2):
    """Pack PyTorch-layout Linear params (out,in) into one lane-dense slab."""
    w1 = jnp.asarray(w1, jnp.float32)
    w2 = jnp.asarray(w2, jnp.float32)
    b1 = jnp.asarray(b1, jnp.float32)
    b2 = jnp.asarray(b2, jnp.float32)
    H = w1.shape[0]
    rows = ((H + 1 + 7) // 8) * 8          # pad sublanes to a multiple of 8
    slab = jnp.zeros((rows, 2 * H), dtype=jnp.float32)
    slab = slab.at[0:H, 0:H].set(w1.T)     # W1^T  (kernel wants (in, out))
    slab = slab.at[0:H, H:2 * H].set(w2.T)  # W2^T
    slab = slab.at[H, 0:H].set(b1)
    slab = slab.at[H, H:2 * H].set(b2)
    return slab


# ----------------------------- module equivalent -----------------------------

class GetActivationLayer:
    """Pallas/JAX equivalent of `get_activation_layer`.

    The forward pass runs ONCE (fused kernel) and records every intermediate;
    prefix i's output is just the captured activation after i children.
    The raw (B, 4H) slab is kept on `self.activation_slab`; the per-prefix
    slices (each an XLA copy) are only materialized to honor the list-return
    contract of the original module.
    """

    def __init__(self, params, total_layers):
        w1, b1, w2, b2 = params
        self.params_slab = _pack_params(w1, b1, w2, b2)   # hoisted once
        self.total_layers = total_layers

    def __call__(self, x):
        x = jnp.asarray(x, jnp.float32)
        H = x.shape[-1]
        slab = _forward_slab(x, self.params_slab)
        self.activation_slab = slab                        # zero-copy handle
        acts = (x,) + tuple(slab[:, i * H:(i + 1) * H] for i in range(4))
        self.outputs = list(acts[: self.total_layers])
        return self.outputs


# ----------------------------------- main ------------------------------------

if __name__ == "__main__":
    key = jax.random.PRNGKey(0)
    k_x, k_w1, k_b1, k_w2, k_b2, k_x2 = jax.random.split(key, 6)

    B, H = 8, 32
    x = jax.random.normal(k_x, (B, H), dtype=jnp.float32)

    # Deterministic synthetic parameters (PyTorch Linear shapes: (out, in)).
    w1 = jax.random.normal(k_w1, (H, H), dtype=jnp.float32) * 0.1
    b1 = jax.random.normal(k_b1, (H,), dtype=jnp.float32) * 0.1
    w2 = jax.random.normal(k_w2, (H, H), dtype=jnp.float32) * 0.1
    b2 = jax.random.normal(k_b2, (H,), dtype=jnp.float32) * 0.1

    total_layers = 5  # prefixes of length 0..4 (identity .. full model)
    module = GetActivationLayer((w1, b1, w2, b2), total_layers)

    # Pure-JAX reference (same prefix semantics as the PyTorch module).
    ref_layers = [
        lambda t: t @ w1.T + b1,
        lambda t: jnp.maximum(t, 0.0),
        lambda t: t @ w2.T + b2,
        lambda t: jnp.maximum(t, 0.0),
    ]

    def check(x_in):
        outs = module(x_in)
        for o in outs:
            jax.block_until_ready(o)
        for i in range(total_layers):
            y = x_in
            for layer in ref_layers[:i]:
                y = layer(y)
            assert jnp.allclose(outs[i], y, atol=1e-5, rtol=1e-5), \
                f"mismatch at prefix {i} (B={x_in.shape[0]})"

    # Small-batch path (grid=(1,)).
    check(x)

    # Larger, ragged batch: exercises tb scaling, >=2 grid steps (v7x TC
    # sharding), and the padded last block (40 rows, tb=16 -> grid=3).
    x_big = jax.random.normal(k_x2, (40, H), dtype=jnp.float32)
    check(x_big)

    print("KERNEL_OK")
</pallas_src>

<mosaic_0001>
module attributes {stable_mosaic.version = 11 : i64} {
  func.func @_fused_prefix_kernel(%arg0: i32, %arg1: memref<8x32xf32, #tpu.memory_space<vmem>>, %arg2: memref<40x64xf32, #tpu.memory_space<vmem>>, %arg3: memref<8x128xf32, #tpu.memory_space<vmem>>) attributes {dimension_semantics = [#tpu.dimension_semantics<parallel>], iteration_bounds = array<i64: 1>, scalar_prefetch = 0 : i64, scratch_operands = 0 : i64, tpu.core_type = #tpu.core_type<tc>, window_params = [{transform_indices = @transform_0, window_bounds = array<i64: 8, 32>}, {pipeline_mode = #tpu.pipeline_mode<synchronous>, transform_indices = @transform_1, window_bounds = array<i64: 40, 64>}, {transform_indices = @transform_2, window_bounds = array<i64: 8, 128>}]} {
    %c0 = arith.constant 0 : index
    %c0_0 = arith.constant 0 : index
    %0 = vector.load %arg1[%c0, %c0_0] : memref<8x32xf32, #tpu.memory_space<vmem>>, vector<8x32xf32>
    %c0_1 = arith.constant 0 : index
    %c0_2 = arith.constant 0 : index
    %1 = vector.load %arg2[%c0_1, %c0_2] : memref<40x64xf32, #tpu.memory_space<vmem>>, vector<32x32xf32>
    %c0_3 = arith.constant 0 : index
    %c32 = arith.constant 32 : index
    %2 = vector.load %arg2[%c0_3, %c32] : memref<40x64xf32, #tpu.memory_space<vmem>>, vector<32x32xf32>
    %c32_4 = arith.constant 32 : index
    %c0_5 = arith.constant 0 : index
    %3 = vector.load %arg2[%c32_4, %c0_5] : memref<40x64xf32, #tpu.memory_space<vmem>>, vector<1x32xf32>
    %c32_6 = arith.constant 32 : index
    %c32_7 = arith.constant 32 : index
    %4 = vector.load %arg2[%c32_6, %c32_7] : memref<40x64xf32, #tpu.memory_space<vmem>>, vector<1x32xf32>
    %cst = arith.constant dense<0.000000e+00> : vector<8x32xf32>
    %5 = tpu.matmul %0, %1, %cst {dimension_numbers = #tpu.dot_dimension_numbers<[1], [0], [0], [1], [0, 0, 1, 1], [], []>} : vector<8x32xf32>, vector<32x32xf32>, vector<8x32xf32> -> vector<8x32xf32>
    %6 = vector.broadcast %3 : vector<1x32xf32> to vector<8x32xf32>
    %7 = arith.addf %5, %6 : vector<8x32xf32>
    %cst_8 = arith.constant 0.000000e+00 : f32
    %8 = vector.broadcast %cst_8 : f32 to vector<8x32xf32>
    %9 = arith.maximumf %7, %8 : vector<8x32xf32>
    %cst_9 = arith.constant dense<0.000000e+00> : vector<8x32xf32>
    %10 = tpu.matmul %9, %2, %cst_9 {dimension_numbers = #tpu.dot_dimension_numbers<[1], [0], [0], [1], [0, 0, 1, 1], [], []>} : vector<8x32xf32>, vector<32x32xf32>, vector<8x32xf32> -> vector<8x32xf32>
    %11 = vector.broadcast %4 : vector<1x32xf32> to vector<8x32xf32>
    %12 = arith.addf %10, %11 : vector<8x32xf32>
    %cst_10 = arith.constant 0.000000e+00 : f32
    %13 = vector.broadcast %cst_10 : f32 to vector<8x32xf32>
    %14 = arith.maximumf %12, %13 : vector<8x32xf32>
    %15 = tpu.concatenate %7, %9, %12, %14 in 1 : vector<8x32xf32>, vector<8x32xf32>, vector<8x32xf32>, vector<8x32xf32> -> vector<8x128xf32>
    %c0_11 = arith.constant 0 : index
    %c0_12 = arith.constant 0 : index
    %16 = vector.load %arg3[%c0_11, %c0_12] : memref<8x128xf32, #tpu.memory_space<vmem>>, vector<8x128xf32>
    tpu.vector_store %arg3[%c0_11, %c0_12], %15 {strides = array<i32>} : memref<8x128xf32, #tpu.memory_space<vmem>>, vector<8x128xf32>,
    return
  }
  func.func @transform_0(%arg0: i32) -> (i32, i32) {
    %c0_i32 = arith.constant 0 : i32
    %c0_i32_0 = arith.constant 0 : i32
    return %arg0, %c0_i32 : i32, i32
  }
  func.func @transform_1(%arg0: i32) -> (i32, i32) {
    %c0_i32 = arith.constant 0 : i32
    %c0_i32_0 = arith.constant 0 : i32
    %c0_i32_1 = arith.constant 0 : i32
    return %c0_i32, %c0_i32_0 : i32, i32
  }
  func.func @transform_2(%arg0: i32) -> (i32, i32) {
    %c0_i32 = arith.constant 0 : i32
    %c0_i32_0 = arith.constant 0 : i32
    return %arg0, %c0_i32 : i32, i32
  }
}

</mosaic_0001>

<bundles_post_ra>
// kernel: _forward_slab.1
= control target key start
LH: loop header
LB: loop body
LE: loop exit
PB: predicated region body
PF: predicated region fallthrough
CT: control target
= control target key end

     0   :  { %7 = vsyncpa [#allocation3], 0  ;;  %s404_s0 = inlined_call_operand.hbm [shape: f32[8,32], index: 0, kind: input, shape index: {}]   ;;  %s405_s1 = inlined_call_operand.hbm [shape: f32[40,64], index: 1, kind: input, shape index: {}]   ;;  %s406_s2 = inlined_call_operand.hbm [shape: f32[8,128], index: 2, kind: output, shape index: {}]  }
   0x1   :  { %8 = vsyncpa [#allocation6], 0 }
   0x2   :  { %9 = vsyncpa [#allocation4], 0  ;;  %s361_s9 = smov [#allocation2]   ;;  %s362_s11 = smov [#allocation5]  }
   0x3   :  { %s16_s10 = sshll.u32 %s361_s9, 4  ;;  %s25_s12 = sshll.u32 %s362_s11, 4  ;;  %s17_s10 = int_to_ptr.vmem [resolvable:$true] %s16_s10  ;;  %s26_s12 = int_to_ptr.vmem [resolvable:$true] %s25_s12 }
   0x4   :  { %s303_s13 = scalar_lea.vmem %s17_s10, 128  ;;  %p308_p1 = scmp.lt.s32.totalorder %s17_s10, %s17_s10 }
   0x5   :  { %p304_p0 = scmp.ne.s32.totalorder %s17_s10, %s303_s13  ;;  %p309_p2 = scmp.lt.s32.totalorder %s303_s13, %s303_s13 }
   0x7   :  { %p310_p3 = por %p309_p2, %p308_p1 }
   0x9   :  { %p311_p4 = pnand %p310_p3, %p304_p0 }
   0xb   :  { %314 = shalt.err (!%p311_p4)
}
   0xc   :  { %19 = dma.hbm_to_vmem [thread:$0]  %s404_s0, 128, %s17_s10, [#allocation3]  }
   0xd   :  { %s323_s16 = scalar_lea.vmem %s26_s12, 640  ;;  %p328_p6 = scmp.lt.s32.totalorder %s26_s12, %s26_s12 }
   0xe   :  { %p324_p5 = scmp.ne.s32.totalorder %s26_s12, %s323_s16  ;;  %p329_p7 = scmp.lt.s32.totalorder %s323_s16, %s323_s16 }
  0x10   :  { %p330_p8 = por %p329_p7, %p328_p6 }
  0x12   :  { %p331_p9 = pnand %p330_p8, %p324_p5 }
  0x14   :  { %334 = shalt.err (!%p331_p9)
}
  0x15   :  { %s363_s17 = smov 128   ;;  %s364_s18 = smov 8  }
  0x16   :  { %31 = dma.hbm_to_vmem [thread:$0]  %s405_s1, 640, %s26_s12, [#allocation6], %s363_s17, %s363_s17, %s364_s18  }
  0x17   :  { %355 = dma.done.wait [#allocation3], 128  }
  0x18   :  { %356 = vsyncadd [#allocation3], 4294967168 }
  0x19   :  { %357 = dma.done.wait [#allocation6], 640  }
  0x1a   :  { %358 = vsyncadd [#allocation6], 4294966656  ;;  %v365_v0 = vmov 0.0   ;;  %vm366_vm0 = vmmov 0   ;;  %v42_v1 = vld [vmem:[#allocation5 + $0x18] sm:$0xff]  ;;  %v41_v2 = vld [vmem:[#allocation5 + $0x10] sm:$0xff] }
  0x1b   :  { %263 = vmatprep.subr.mxu0 %v365_v0  ;;  %271 = vmatprep.mubr.msk.f32.mxu0 %vm366_vm0, %v365_v0  ;;  %v40_v3 = vld [vmem:[#allocation5 + $0x8] sm:$0xff]  ;;  %s367_s0 = smov 96   ;;  %v39_v4 = vld [vmem:[#allocation5] sm:$0xff]  ;;  %v38_v5 = vld [vmem:[#allocation2] sm:$0xff]  ;;  %vm48_vm1 = vcmask 261120   ;;  %s368_s1 = smov 32  }
  0x1c   :  { %274 = vmatprep.subr.mxu1 %v365_v0  ;;  %282 = vmatprep.mubr.msk.f32.mxu1 %vm366_vm0, %v365_v0  ;;  %v250_v6 = vld [vmem:[#allocation5 + $0x20] ss:$0 sm:$0xff]  ;;  %s369_s21 = smov 64   ;;  %vm229_vm2 = vcmask 523264   ;;  %s370_s22 = smov [#allocation7]   ;;  %vm231_vm3 = vcmask 785408  }
  0x1d   :  { %264 = vmatpush3.msra.mxu0 %v42_v1  ;;  %133 = vrot.lane.b32.xlu0 %v42_v1, %s367_s0  ;;  %s240_s23 = sshll.u32 %s370_s22, 4  ;;  %s241_s23 = int_to_ptr.vmem [resolvable:$true] %s240_s23 }
  0x1e   :  { %265 = vmatprep.subr.mxu0 %v365_v0  ;;  %129 = vrot.lane.b32.xlu1 %v40_v3, %s367_s0  ;;  %s335_s24 = scalar_lea.vmem %s241_s23, 128  ;;  %p340_p11 = scmp.lt.s32.totalorder %s241_s23, %s241_s23 }
  0x1f   :  { %266 = vmatpush3.msra.mxu0 %v41_v2  ;;  %p336_p10 = scmp.ne.s32.totalorder %s241_s23, %s335_s24  ;;  %p341_p12 = scmp.lt.s32.totalorder %s335_s24, %s335_s24 }
  0x20   :  { %267 = vmatprep.subr.mxu0 %v365_v0 }
  0x21   :  { %268 = vmatpush3.msra.mxu0 %v40_v3  ;;  %131 = vrot.lane.b32.xlu0 %v41_v2, %s367_s0  ;;  %p342_p13 = por %p341_p12, %p340_p11 }
  0x22   :  { %269 = vmatprep.subr.mxu0 %v365_v0  ;;  %127 = vrot.lane.b32.xlu1 %v39_v4, %s367_s0 }
  0x23   :  { %270 = vmatpush3.msra.mxu0 %v39_v4  ;;  %p343_p0 = pnand %p342_p13, %p336_p10 }
  0x24   :  { %272 = vmatmul.mubr.msk.f32.vlgmr.msra.gmra.mxu0 %vm48_vm1, %v38_v5 }
  0x25   :  { %140 = vrot.lane.b32.xlu0 %v250_v6, %s367_s0 }
  0x8f   :  { %v134_v7 = vpop.permute.xlu0 %133 }
  0x90   :  { %275 = vmatpush3.msra.mxu1 %v134_v7  ;;  %v130_v8 = vpop.permute.xlu1 %129 }
  0x91   :  { %276 = vmatprep.subr.mxu1 %v365_v0 }
  0x93   :  { %v132_v9 = vpop.permute.xlu0 %131 }
  0x94   :  { %277 = vmatpush3.msra.mxu1 %v132_v9  ;;  %v128_v10 = vpop.permute.xlu1 %127 }
  0x95   :  { %278 = vmatprep.subr.mxu1 %v365_v0 }
  0x96   :  { %279 = vmatpush3.msra.mxu1 %v130_v8 }
  0x97   :  { %280 = vmatprep.subr.mxu1 %v365_v0  ;;  %v141_v15 = vpop.permute.xlu0 %140 }
  0x98   :  { %281 = vmatpush3.msra.mxu1 %v128_v10 }
  0xe4   :  { %v118_v11 = vpop.f32.mrf.mxu0 }
  0xe5   :  { %v119_v12 = vadd.f32 %v250_v6, %v118_v11 }
  0xe6   :  { %v273_v13 = vpop.f32.mrf.mxu0 }
  0xe7   :  { %v122_v14 = vmax.f32 %v119_v12, 0.0 }
  0xe9   :  { %217 = vrot.lane.b32.xlu1 %v122_v14, %s368_s1  ;;  %283 = vmatmul.mubr.msk.f32.vlgmr.msra.gmra.mxu1 %vm48_vm1, %v122_v14 }
 0x15b   :  { %v218_v20 = vpop.permute.xlu1 %217 }
 0x15c   :  { %v228_v21 = vsel %vm48_vm1, %v119_v12, %v218_v20 }
 0x1a9   :  { %v212_v16 = vpop.f32.mrf.mxu1 }
 0x1aa   :  { %v213_v17 = vadd.f32 %v212_v16, %v141_v15 }
 0x1ab   :  { %v284_v18 = vpop.f32.mrf.mxu1 }
 0x1ac   :  { %v216_v19 = vmax.f32 %v213_v17, 0.0  ;;  %221 = vrot.lane.b32.xlu0 %v213_v17, %s369_s21 }
 0x1ae   :  { %225 = vrot.lane.b32.xlu1 %v216_v19, %s367_s0 }
 0x21e   :  { %v222_v22 = vpop.permute.xlu0 %221 }
 0x21f   :  { %v230_v23 = vsel %vm229_vm2, %v228_v21, %v222_v22 }
 0x220   :  { %v226_v24 = vpop.permute.xlu1 %225 }
 0x221   :  { %v232_v25 = vsel %vm231_vm3, %v230_v23, %v226_v24 }
 0x222   :  { %233 = vst [vmem:[#allocation7] sm:$0xff] %v232_v25 }
 0x223   :  { %346 = shalt.err (!%p343_p0)
}
 0x224   :  { %243 = dma.vmem_to_hbm [thread:$0]  %s241_s23, 128, %s406_s2, [#allocation4]  }
 0x225   :  { %359 = dma.done.wait [#allocation4], 128  }
 0x226   :  { %360 = vsyncadd [#allocation4], 4294967168 }
 0x227   :  { %247 = vsyncpa [#allocation3], 1 }
 0x228   :  { %248 = vsyncpa [#allocation6], 1 }
 0x229   :  { %249 = vsyncpa [#allocation4], 1 }

</bundles_post_ra>
